<compile_context>
chip_gen: v5e
topology: v5e:2x2
jax: 0.10.0
libtpu: 0.0.40
codegen_flags: <defaults>
</compile_context>

<pallas_src>
import functools
import math

import jax
import jax.numpy as jnp
from jax.experimental import pallas as pl
from jax.experimental.pallas import tpu as pltpu

LN_EPS = 1e-5


def _layer_norm_f32(v, g, b):
    mean = jnp.mean(v, axis=-1, keepdims=True)
    var = jnp.mean(jnp.square(v - mean), axis=-1, keepdims=True)
    return (v - mean) * jax.lax.rsqrt(var + LN_EPS) * g + b


def _mha_block_kernel(
    # inputs
    x_ref,                     # (1, S, D) f32  — full sequence for this batch row
    g_pre_ref, b_pre_ref,      # (1, D) f32
    wqkv_ref, bqkv_ref,        # (D, 3D) bf16, (1, 3D) f32   fused Q|K|V projection
    wo_ref, bo_ref,            # (D, D) bf16, (1, D) f32
    g_post_ref, b_post_ref,    # (1, D) f32
    # outputs
    o_ref,                     # (1, tq, D) f32
    # scratch (persists across the q-tile grid axis)
    xn_scr,                    # (S, D) bf16     LN_pre(x): residual + projection input
    q_scr, k_scr, v_scr,       # (H, S, Dh) bf16 head-major projections
    ctx_scr,                   # (tq, D) bf16    lane-dense concatenated head contexts
    *, num_heads: int, head_dim: int, d_model: int, q_tile: int,
):
    qi = pl.program_id(1)

    # ---- once per batch row: LayerNorm_pre + fused QKV projection into scratch ----
    @pl.when(qi == 0)
    def _():
        x = x_ref[0].astype(jnp.float32)                              # (S, D)
        xn = _layer_norm_f32(x, g_pre_ref[...], b_pre_ref[...])
        xn_bf = xn.astype(jnp.bfloat16)
        xn_scr[...] = xn_bf                                           # bf16 residual
        # single (S, 3D) MXU matmul: bf16 operands, f32 accumulation
        qkv = jnp.dot(xn_bf, wqkv_ref[...],
                      preferred_element_type=jnp.float32) + bqkv_ref[...]
        inv_sqrt_dk = 1.0 / math.sqrt(head_dim)
        # one cast per Q/K/V chunk; 1/sqrt(dk) folded into Q in f32 before the cast
        q_bf = (qkv[:, :d_model] * inv_sqrt_dk).astype(jnp.bfloat16)
        k_bf = qkv[:, d_model:2 * d_model].astype(jnp.bfloat16)
        v_bf = qkv[:, 2 * d_model:3 * d_model].astype(jnp.bfloat16)
        for h in range(num_heads):                                    # static unroll
            lo = h * head_dim
            q_scr[h] = q_bf[:, lo:lo + head_dim]
            k_scr[h] = k_bf[:, lo:lo + head_dim]
            v_scr[h] = v_bf[:, lo:lo + head_dim]

    # ---- batched-head attention for this query tile ----
    q0 = pl.multiple_of(qi * q_tile, q_tile)
    q_t = q_scr[:, pl.ds(q0, q_tile), :]                              # (H, tq, Dh) bf16
    k_a = k_scr[...]                                                  # (H, S,  Dh) bf16
    v_a = v_scr[...]                                                  # (H, S,  Dh) bf16

    s = jnp.einsum("hqd,hkd->hqk", q_t, k_a,
                   preferred_element_type=jnp.float32)                # (H, tq, S) f32
    s = s - jnp.max(s, axis=-1, keepdims=True)
    p = jnp.exp(s)
    row_sum = jnp.sum(p, axis=-1, keepdims=True)                      # (H, tq, 1)
    ctx = jnp.einsum("hqk,hkd->hqd", p.astype(jnp.bfloat16), v_a,
                     preferred_element_type=jnp.float32)              # (H, tq, Dh) f32
    # normalize AFTER the PV matmul: multiply over (H,tq,Dh) instead of (H,tq,S)
    ctx = ctx * pl.reciprocal(row_sum, approx=True)
    ctx_bf = ctx.astype(jnp.bfloat16)

    # ---- output projection: lane-dense head concat -> one big-K matmul ----
    for h in range(num_heads):                                        # static unroll
        lo = h * head_dim
        ctx_scr[:, lo:lo + head_dim] = ctx_bf[h]
    out = jnp.dot(ctx_scr[...], wo_ref[...],
                  preferred_element_type=jnp.float32)                 # (tq, D) f32
    # Dropout(p=0.1) -> identity (eval mode); residual is LN_pre(x) per the PyTorch code.
    out = out + bo_ref[...] + xn_scr[pl.ds(q0, q_tile), :].astype(jnp.float32)

    # ---- LayerNorm_post ----
    out = _layer_norm_f32(out, g_post_ref[...], b_post_ref[...])
    o_ref[0] = out.astype(o_ref.dtype)


def _round_up(v, m):
    return (v + m - 1) // m * m


def _vmem_capacity_bytes():
    """Physical VMEM of the current chip (conservative 64 MiB fallback, safe on v7x)."""
    try:
        info = pltpu.get_tpu_info()
        cap = getattr(info, "vmem_capacity_bytes", None)
        if cap:
            return int(cap)
    except Exception:
        pass
    return 64 * 1024 * 1024


def _pick_q_tile(S, D, H, Dh, vmem_cap):
    """Largest q-tile whose score temporaries + fixed footprint fit the chip's VMEM."""
    if S <= 256:
        return S
    fixed = (S * D * 4                       # x input block (single-buffered)
             + S * D * 2                     # xn bf16 scratch
             + 3 * S * D * 2                 # Q/K/V bf16 scratch
             + (3 * D * D + D * D) * 2       # bf16 weights
             + S * 3 * D * 4 + S * 3 * D * 2)  # fused-QKV projection temporaries
    budget = int(vmem_cap * 0.70) - fixed
    for cand in (256, 128, 64, 32, 16, 8):
        if S % cand != 0:
            continue
        temps = (2 * H * cand * S * 4        # scores s + exp(s), f32
                 + H * cand * S * 2          # p bf16
                 + 2 * H * cand * Dh * 4     # ctx f32 + bf16
                 + 6 * cand * D * 4)         # out temporaries + double-buffered output
        if temps <= budget:
            return cand
    return 8 if S % 8 == 0 else S


def _vmem_budget_bytes(S, D, H, Dh, tq, vmem_cap):
    """Rough padded-VMEM budget, capped below the physical VMEM of the chip."""
    def padded(rows, cols, itemsize, sublane=8):
        return _round_up(rows, sublane) * _round_up(cols, 128) * itemsize

    x_blk = padded(S, D, 4)                               # input block (single-buffered)
    o_blk = 2 * padded(tq, D, 4)                          # output block, double-buffered
    w = padded(D, 3 * D, 2, 16) + padded(D, D, 2, 16)     # bf16 weights, single-buffered
    vecs = 8 * padded(1, 3 * D, 4)                        # biases / LN params
    scr = (padded(S, D, 2, 16) + 3 * H * padded(S, Dh, 2, 16)
           + padded(tq, D, 2, 16))                        # xn + QKV + ctx scratch
    tmp = padded(S, 3 * D, 4) + padded(S, 3 * D, 2, 16)   # fused QKV projection temps
    tmp += 2 * H * padded(tq, S, 4) + H * padded(tq, S, 2, 16)   # scores / exp / p
    tmp += 2 * H * padded(tq, Dh, 4) + 4 * padded(tq, D, 4)
    est = x_blk + o_blk + w + vecs + scr + tmp
    cap = int(vmem_cap * 0.85)
    return int(min(cap, max(32 * 1024 * 1024, 2 * est)))


def multi_head_att_block_s(x, params, num_heads, q_tile=None):
    """x: (B, S, D) float32.  params: dict of f32 weights (see init_params)."""
    B, S, D = x.shape
    assert D % num_heads == 0, "d_model must be divisible by num_heads"
    head_dim = D // num_heads
    vmem_cap = _vmem_capacity_bytes()
    if q_tile is None:
        q_tile = _pick_q_tile(S, D, num_heads, head_dim, vmem_cap)
    assert S % q_tile == 0
    n_q = S // q_tile

    # Fuse Q|K|V weights into one (D, 3D) matrix; cast matmul weights to bf16 host-side.
    wqkv = jnp.concatenate(
        [params["wq_t"], params["wk_t"], params["wv_t"]], axis=1).astype(jnp.bfloat16)
    bqkv = jnp.concatenate([params["bq"], params["bk"], params["bv"]], axis=1)
    wo = params["wo_t"].astype(jnp.bfloat16)

    kernel = functools.partial(
        _mha_block_kernel, num_heads=num_heads, head_dim=head_dim,
        d_model=D, q_tile=q_tile)

    const_idx = lambda b, q: (0, 0)

    def param_spec(shape):
        # Constant across the whole grid -> fetched once; single-buffered to halve VMEM.
        return pl.BlockSpec(shape, const_idx, pipeline_mode=pl.Buffered(1))

    flops = 2 * B * (4 * S * D * D + 2 * S * S * D)
    transcendentals = B * num_heads * S * S
    bytes_accessed = (2 * B * S * D * 4              # x in + out
                      + (D * 3 * D + D * D) * 2      # bf16 weights
                      + (3 * D + D + 4 * D) * 4)     # biases + LN params

    return pl.pallas_call(
        kernel,
        out_shape=jax.ShapeDtypeStruct((B, S, D), x.dtype),
        grid_spec=pltpu.PrefetchScalarGridSpec(
            num_scalar_prefetch=0,
            grid=(B, n_q),
            in_specs=[
                # x: full sequence per batch row; only read at q-tile 0 -> single-buffer.
                pl.BlockSpec((1, S, D), lambda b, q: (b, 0, 0),
                             pipeline_mode=pl.Buffered(1)),
                param_spec((1, D)), param_spec((1, D)),               # LN_pre gamma, beta
                param_spec((D, 3 * D)), param_spec((1, 3 * D)),       # fused Wqkv^T, bqkv
                param_spec((D, D)), param_spec((1, D)),               # Wo^T, bo
                param_spec((1, D)), param_spec((1, D)),               # LN_post gamma, beta
            ],
            out_specs=pl.BlockSpec((1, q_tile, D), lambda b, q: (b, q, 0)),
            scratch_shapes=[
                pltpu.VMEM((S, D), jnp.bfloat16),                      # LN_pre(x), bf16
                pltpu.VMEM((num_heads, S, head_dim), jnp.bfloat16),    # Q (pre-scaled)
                pltpu.VMEM((num_heads, S, head_dim), jnp.bfloat16),    # K
                pltpu.VMEM((num_heads, S, head_dim), jnp.bfloat16),    # V
                pltpu.VMEM((q_tile, D), jnp.bfloat16),                 # ctx head-concat
            ],
        ),
        compiler_params=pltpu.CompilerParams(
            # Batch axis parallel (megacore). On v7x (2 TC/chip) use B >= 2 for both cores.
            dimension_semantics=("parallel", "arbitrary"),
            vmem_limit_bytes=_vmem_budget_bytes(S, D, num_heads, head_dim, q_tile,
                                                vmem_cap),
        ),
        cost_estimate=pl.CostEstimate(
            flops=flops, transcendentals=transcendentals, bytes_accessed=bytes_accessed),
    )(
        x,
        params["ln_pre_g"], params["ln_pre_b"],
        wqkv, bqkv,
        wo, params["bo"],
        params["ln_post_g"], params["ln_post_b"],
    )


def init_params(key, d_model):
    """Deterministic synthetic init matching nn.Linear/nn.LayerNorm shapes (f32)."""
    ks = jax.random.split(key, 8)
    bound = 1.0 / math.sqrt(d_model)

    def linear(kw, kb):
        # PyTorch nn.Linear stores W as (out, in); kernel uses W^T so y = x @ W^T.
        w = jax.random.uniform(kw, (d_model, d_model), jnp.float32, -bound, bound)
        b = jax.random.uniform(kb, (1, d_model), jnp.float32, -bound, bound)
        return w.T, b

    wq_t, bq = linear(ks[0], ks[1])
    wk_t, bk = linear(ks[2], ks[3])
    wv_t, bv = linear(ks[4], ks[5])
    wo_t, bo = linear(ks[6], ks[7])
    return {
        "ln_pre_g": jnp.ones((1, d_model), jnp.float32),
        "ln_pre_b": jnp.zeros((1, d_model), jnp.float32),
        "wq_t": wq_t, "bq": bq,
        "wk_t": wk_t, "bk": bk,
        "wv_t": wv_t, "bv": bv,
        "wo_t": wo_t, "bo": bo,
        "ln_post_g": jnp.ones((1, d_model), jnp.float32),
        "ln_post_b": jnp.zeros((1, d_model), jnp.float32),
    }


def _reference(x, params, num_heads):
    """Pure-JAX f32 reference of the PyTorch forward (ground-truth semantics)."""
    B, S, D = x.shape
    Dh = D // num_heads

    def ln(v, g, b):
        m = jnp.mean(v, -1, keepdims=True)
        var = jnp.mean((v - m) ** 2, -1, keepdims=True)
        return (v - m) / jnp.sqrt(var + LN_EPS) * g + b

    xn = ln(x, params["ln_pre_g"], params["ln_pre_b"])
    q = xn @ params["wq_t"] + params["bq"]
    k = xn @ params["wk_t"] + params["bk"]
    v = xn @ params["wv_t"] + params["bv"]
    q = q.reshape(B, S, num_heads, Dh).transpose(0, 2, 1, 3)
    k = k.reshape(B, S, num_heads, Dh).transpose(0, 2, 1, 3)
    v = v.reshape(B, S, num_heads, Dh).transpose(0, 2, 1, 3)
    s = jnp.einsum("bhqd,bhkd->bhqk", q, k) / math.sqrt(Dh)
    p = jax.nn.softmax(s, axis=-1)
    o = jnp.einsum("bhqk,bhkd->bhqd", p, v)
    o = o.transpose(0, 2, 1, 3).reshape(B, S, D)
    o = o @ params["wo_t"] + params["bo"] + xn
    return ln(o, params["ln_post_g"], params["ln_post_b"])


if __name__ == "__main__":
    # Small smoke-test shapes (lane widths < 128 here; the kernel targets D, S that are
    # multiples of 128 — the layout/tiling choices are made for that regime).
    B, S, D, H = 2, 8, 32, 4
    key = jax.random.PRNGKey(0)
    kx, kp = jax.random.split(key)
    x = jax.random.normal(kx, (B, S, D), jnp.float32)
    params = init_params(kp, D)

    out = jax.block_until_ready(multi_head_att_block_s(x, params, num_heads=H))
    ref = _reference(x, params, num_heads=H)

    assert out.shape == (B, S, D)
    err = float(jnp.max(jnp.abs(out - ref)))
    # Tolerance widened vs. the pure-f32 reference because matmul operands are bf16
    # (f32 accumulation), the residual is kept in bf16 scratch, and the softmax uses
    # the EUP approximate reciprocal.
    assert err < 5e-2, err
    print("KERNEL_OK")
</pallas_src>

<mosaic_0001>
module attributes {stable_mosaic.version = 11 : i64} {
  func.func @_mha_block_kernel(%arg0: i32, %arg1: i32, %arg2: memref<1x8x32xf32, #tpu.memory_space<vmem>>, %arg3: memref<1x32xf32, #tpu.memory_space<vmem>>, %arg4: memref<1x32xf32, #tpu.memory_space<vmem>>, %arg5: memref<32x96xbf16, #tpu.memory_space<vmem>>, %arg6: memref<1x96xf32, #tpu.memory_space<vmem>>, %arg7: memref<32x32xbf16, #tpu.memory_space<vmem>>, %arg8: memref<1x32xf32, #tpu.memory_space<vmem>>, %arg9: memref<1x32xf32, #tpu.memory_space<vmem>>, %arg10: memref<1x32xf32, #tpu.memory_space<vmem>>, %arg11: memref<1x8x32xf32, #tpu.memory_space<vmem>>, %arg12: memref<8x32xbf16, #tpu.memory_space<vmem>>, %arg13: memref<4x8x8xbf16, #tpu.memory_space<vmem>>, %arg14: memref<4x8x8xbf16, #tpu.memory_space<vmem>>, %arg15: memref<4x8x8xbf16, #tpu.memory_space<vmem>>, %arg16: memref<8x32xbf16, #tpu.memory_space<vmem>>) attributes {dimension_semantics = [#tpu.dimension_semantics<parallel>, #tpu.dimension_semantics<arbitrary>], iteration_bounds = array<i64: 2, 1>, scalar_prefetch = 0 : i64, scratch_operands = 5 : i64, tpu.core_type = #tpu.core_type<tc>, window_params = [{pipeline_mode = #tpu.pipeline_mode<synchronous>, transform_indices = @transform_0, window_bounds = array<i64: 1, 8, 32>}, {pipeline_mode = #tpu.pipeline_mode<synchronous>, transform_indices = @transform_1, window_bounds = array<i64: 1, 32>}, {pipeline_mode = #tpu.pipeline_mode<synchronous>, transform_indices = @transform_2, window_bounds = array<i64: 1, 32>}, {pipeline_mode = #tpu.pipeline_mode<synchronous>, transform_indices = @transform_3, window_bounds = array<i64: 32, 96>}, {pipeline_mode = #tpu.pipeline_mode<synchronous>, transform_indices = @transform_4, window_bounds = array<i64: 1, 96>}, {pipeline_mode = #tpu.pipeline_mode<synchronous>, transform_indices = @transform_5, window_bounds = array<i64: 32, 32>}, {pipeline_mode = #tpu.pipeline_mode<synchronous>, transform_indices = @transform_6, window_bounds = array<i64: 1, 32>}, {pipeline_mode = #tpu.pipeline_mode<synchronous>, transform_indices = @transform_7, window_bounds = array<i64: 1, 32>}, {pipeline_mode = #tpu.pipeline_mode<synchronous>, transform_indices = @transform_8, window_bounds = array<i64: 1, 32>}, {transform_indices = @transform_9, window_bounds = array<i64: 1, 8, 32>}]} {
    %c0_i32 = arith.constant 0 : i32
    %0 = arith.cmpi eq, %arg1, %c0_i32 : i32
    %1 = arith.extui %0 : i1 to i32
    %c0_i32_0 = arith.constant 0 : i32
    %2 = arith.cmpi ne, %1, %c0_i32_0 : i32
    scf.if %2 {
      %c0_36 = arith.constant 0 : index
      %c0_37 = arith.constant 0 : index
      %c0_38 = arith.constant 0 : index
      %72 = vector.load %arg2[%c0_36, %c0_37, %c0_38] : memref<1x8x32xf32, #tpu.memory_space<vmem>>, vector<1x8x32xf32>
      %73 = vector.shape_cast %72 : vector<1x8x32xf32> to vector<8x32xf32>
      %c0_39 = arith.constant 0 : index
      %c0_40 = arith.constant 0 : index
      %74 = vector.load %arg3[%c0_39, %c0_40] : memref<1x32xf32, #tpu.memory_space<vmem>>, vector<1x32xf32>
      %c0_41 = arith.constant 0 : index
      %c0_42 = arith.constant 0 : index
      %75 = vector.load %arg4[%c0_41, %c0_42] : memref<1x32xf32, #tpu.memory_space<vmem>>, vector<1x32xf32>
      %cst_43 = arith.constant dense<0.000000e+00> : vector<8xf32>
      %76 = vector.multi_reduction <add>, %73, %cst_43 [1] : vector<8x32xf32> to vector<8xf32>
      %77 = vector.shape_cast %76 : vector<8xf32> to vector<8x1xf32>
      %cst_44 = arith.constant 3.200000e+01 : f32
      %78 = vector.broadcast %cst_44 : f32 to vector<8x1xf32>
      %79 = arith.divf %77, %78 : vector<8x1xf32>
      %80 = vector.broadcast %79 : vector<8x1xf32> to vector<8x32xf32>
      %81 = arith.subf %73, %80 : vector<8x32xf32>
      %82 = arith.mulf %81, %81 : vector<8x32xf32>
      %cst_45 = arith.constant dense<0.000000e+00> : vector<8xf32>
      %83 = vector.multi_reduction <add>, %82, %cst_45 [1] : vector<8x32xf32> to vector<8xf32>
      %84 = vector.shape_cast %83 : vector<8xf32> to vector<8x1xf32>
      %cst_46 = arith.constant 3.200000e+01 : f32
      %85 = vector.broadcast %cst_46 : f32 to vector<8x1xf32>
      %86 = arith.divf %84, %85 : vector<8x1xf32>
      %87 = vector.broadcast %79 : vector<8x1xf32> to vector<8x32xf32>
      %88 = arith.subf %73, %87 : vector<8x32xf32>
      %cst_47 = arith.constant 9.99999974E-6 : f32
      %89 = vector.broadcast %cst_47 : f32 to vector<8x1xf32>
      %90 = arith.addf %86, %89 : vector<8x1xf32>
      %91 = math.rsqrt %90 : vector<8x1xf32>
      %92 = vector.broadcast %91 : vector<8x1xf32> to vector<8x32xf32>
      %93 = arith.mulf %88, %92 : vector<8x32xf32>
      %94 = vector.broadcast %74 : vector<1x32xf32> to vector<8x32xf32>
      %95 = arith.mulf %93, %94 : vector<8x32xf32>
      %96 = vector.broadcast %75 : vector<1x32xf32> to vector<8x32xf32>
      %97 = arith.addf %95, %96 : vector<8x32xf32>
      %98 = arith.truncf %97 : vector<8x32xf32> to vector<8x32xbf16>
      %c0_48 = arith.constant 0 : index
      %c0_49 = arith.constant 0 : index
      %99 = vector.load %arg12[%c0_48, %c0_49] : memref<8x32xbf16, #tpu.memory_space<vmem>>, vector<8x32xbf16>
      tpu.vector_store %arg12[%c0_48, %c0_49], %98 {strides = array<i32>} : memref<8x32xbf16, #tpu.memory_space<vmem>>, vector<8x32xbf16>,
      %c0_50 = arith.constant 0 : index
      %c0_51 = arith.constant 0 : index
      %100 = vector.load %arg5[%c0_50, %c0_51] : memref<32x96xbf16, #tpu.memory_space<vmem>>, vector<32x96xbf16>
      %cst_52 = arith.constant dense<0.000000e+00> : vector<8x96xf32>
      %101 = tpu.matmul %98, %100, %cst_52 {dimension_numbers = #tpu.dot_dimension_numbers<[1], [0], [0], [1], [0, 0, 1, 1], [], []>} : vector<8x32xbf16>, vector<32x96xbf16>, vector<8x96xf32> -> vector<8x96xf32>
      %c0_53 = arith.constant 0 : index
      %c0_54 = arith.constant 0 : index
      %102 = vector.load %arg6[%c0_53, %c0_54] : memref<1x96xf32, #tpu.memory_space<vmem>>, vector<1x96xf32>
      %103 = vector.broadcast %102 : vector<1x96xf32> to vector<8x96xf32>
      %104 = arith.addf %101, %103 : vector<8x96xf32>
      %105 = vector.extract_strided_slice %104 {offsets = [0, 0], sizes = [8, 32], strides = [1, 1]} : vector<8x96xf32> to vector<8x32xf32>
      %cst_55 = arith.constant 0.353553385 : f32
      %106 = vector.broadcast %cst_55 : f32 to vector<8x32xf32>
      %107 = arith.mulf %105, %106 : vector<8x32xf32>
      %108 = arith.truncf %107 : vector<8x32xf32> to vector<8x32xbf16>
      %109 = vector.extract_strided_slice %104 {offsets = [0, 32], sizes = [8, 32], strides = [1, 1]} : vector<8x96xf32> to vector<8x32xf32>
      %110 = arith.truncf %109 : vector<8x32xf32> to vector<8x32xbf16>
      %111 = vector.extract_strided_slice %104 {offsets = [0, 64], sizes = [8, 32], strides = [1, 1]} : vector<8x96xf32> to vector<8x32xf32>
      %112 = arith.truncf %111 : vector<8x32xf32> to vector<8x32xbf16>
      %113 = vector.extract_strided_slice %108 {offsets = [0, 0], sizes = [8, 8], strides = [1, 1]} : vector<8x32xbf16> to vector<8x8xbf16>
      %c0_56 = arith.constant 0 : index
      %c0_57 = arith.constant 0 : index
      %c0_58 = arith.constant 0 : index
      %114 = vector.load %arg13[%c0_56, %c0_57, %c0_58] : memref<4x8x8xbf16, #tpu.memory_space<vmem>>, vector<1x8x8xbf16>
      %115 = vector.shape_cast %114 : vector<1x8x8xbf16> to vector<8x8xbf16>
      %116 = vector.shape_cast %113 : vector<8x8xbf16> to vector<1x8x8xbf16>
      tpu.vector_store %arg13[%c0_56, %c0_57, %c0_58], %116 {strides = array<i32>} : memref<4x8x8xbf16, #tpu.memory_space<vmem>>, vector<1x8x8xbf16>,
      %117 = vector.extract_strided_slice %110 {offsets = [0, 0], sizes = [8, 8], strides = [1, 1]} : vector<8x32xbf16> to vector<8x8xbf16>
      %c0_59 = arith.constant 0 : index
      %c0_60 = arith.constant 0 : index
      %c0_61 = arith.constant 0 : index
      %118 = vector.load %arg14[%c0_59, %c0_60, %c0_61] : memref<4x8x8xbf16, #tpu.memory_space<vmem>>, vector<1x8x8xbf16>
      %119 = vector.shape_cast %118 : vector<1x8x8xbf16> to vector<8x8xbf16>
      %120 = vector.shape_cast %117 : vector<8x8xbf16> to vector<1x8x8xbf16>
      tpu.vector_store %arg14[%c0_59, %c0_60, %c0_61], %120 {strides = array<i32>} : memref<4x8x8xbf16, #tpu.memory_space<vmem>>, vector<1x8x8xbf16>,
      %121 = vector.extract_strided_slice %112 {offsets = [0, 0], sizes = [8, 8], strides = [1, 1]} : vector<8x32xbf16> to vector<8x8xbf16>
      %c0_62 = arith.constant 0 : index
      %c0_63 = arith.constant 0 : index
      %c0_64 = arith.constant 0 : index
      %122 = vector.load %arg15[%c0_62, %c0_63, %c0_64] : memref<4x8x8xbf16, #tpu.memory_space<vmem>>, vector<1x8x8xbf16>
      %123 = vector.shape_cast %122 : vector<1x8x8xbf16> to vector<8x8xbf16>
      %124 = vector.shape_cast %121 : vector<8x8xbf16> to vector<1x8x8xbf16>
      tpu.vector_store %arg15[%c0_62, %c0_63, %c0_64], %124 {strides = array<i32>} : memref<4x8x8xbf16, #tpu.memory_space<vmem>>, vector<1x8x8xbf16>,
      %125 = vector.extract_strided_slice %108 {offsets = [0, 8], sizes = [8, 8], strides = [1, 1]} : vector<8x32xbf16> to vector<8x8xbf16>
      %c1 = arith.constant 1 : index
      %c0_65 = arith.constant 0 : index
      %c0_66 = arith.constant 0 : index
      %126 = vector.load %arg13[%c1, %c0_65, %c0_66] : memref<4x8x8xbf16, #tpu.memory_space<vmem>>, vector<1x8x8xbf16>
      %127 = vector.shape_cast %126 : vector<1x8x8xbf16> to vector<8x8xbf16>
      %128 = vector.shape_cast %125 : vector<8x8xbf16> to vector<1x8x8xbf16>
      tpu.vector_store %arg13[%c1, %c0_65, %c0_66], %128 {strides = array<i32>} : memref<4x8x8xbf16, #tpu.memory_space<vmem>>, vector<1x8x8xbf16>,
      %129 = vector.extract_strided_slice %110 {offsets = [0, 8], sizes = [8, 8], strides = [1, 1]} : vector<8x32xbf16> to vector<8x8xbf16>
      %c1_67 = arith.constant 1 : index
      %c0_68 = arith.constant 0 : index
      %c0_69 = arith.constant 0 : index
      %130 = vector.load %arg14[%c1_67, %c0_68, %c0_69] : memref<4x8x8xbf16, #tpu.memory_space<vmem>>, vector<1x8x8xbf16>
      %131 = vector.shape_cast %130 : vector<1x8x8xbf16> to vector<8x8xbf16>
      %132 = vector.shape_cast %129 : vector<8x8xbf16> to vector<1x8x8xbf16>
      tpu.vector_store %arg14[%c1_67, %c0_68, %c0_69], %132 {strides = array<i32>} : memref<4x8x8xbf16, #tpu.memory_space<vmem>>, vector<1x8x8xbf16>,
      %133 = vector.extract_strided_slice %112 {offsets = [0, 8], sizes = [8, 8], strides = [1, 1]} : vector<8x32xbf16> to vector<8x8xbf16>
      %c1_70 = arith.constant 1 : index
      %c0_71 = arith.constant 0 : index
      %c0_72 = arith.constant 0 : index
      %134 = vector.load %arg15[%c1_70, %c0_71, %c0_72] : memref<4x8x8xbf16, #tpu.memory_space<vmem>>, vector<1x8x8xbf16>
      %135 = vector.shape_cast %134 : vector<1x8x8xbf16> to vector<8x8xbf16>
      %136 = vector.shape_cast %133 : vector<8x8xbf16> to vector<1x8x8xbf16>
      tpu.vector_store %arg15[%c1_70, %c0_71, %c0_72], %136 {strides = array<i32>} : memref<4x8x8xbf16, #tpu.memory_space<vmem>>, vector<1x8x8xbf16>,
      %137 = vector.extract_strided_slice %108 {offsets = [0, 16], sizes = [8, 8], strides = [1, 1]} : vector<8x32xbf16> to vector<8x8xbf16>
      %c2 = arith.constant 2 : index
      %c0_73 = arith.constant 0 : index
      %c0_74 = arith.constant 0 : index
      %138 = vector.load %arg13[%c2, %c0_73, %c0_74] : memref<4x8x8xbf16, #tpu.memory_space<vmem>>, vector<1x8x8xbf16>
      %139 = vector.shape_cast %138 : vector<1x8x8xbf16> to vector<8x8xbf16>
      %140 = vector.shape_cast %137 : vector<8x8xbf16> to vector<1x8x8xbf16>
      tpu.vector_store %arg13[%c2, %c0_73, %c0_74], %140 {strides = array<i32>} : memref<4x8x8xbf16, #tpu.memory_space<vmem>>, vector<1x8x8xbf16>,
      %141 = vector.extract_strided_slice %110 {offsets = [0, 16], sizes = [8, 8], strides = [1, 1]} : vector<8x32xbf16> to vector<8x8xbf16>
      %c2_75 = arith.constant 2 : index
      %c0_76 = arith.constant 0 : index
      %c0_77 = arith.constant 0 : index
      %142 = vector.load %arg14[%c2_75, %c0_76, %c0_77] : memref<4x8x8xbf16, #tpu.memory_space<vmem>>, vector<1x8x8xbf16>
      %143 = vector.shape_cast %142 : vector<1x8x8xbf16> to vector<8x8xbf16>
      %144 = vector.shape_cast %141 : vector<8x8xbf16> to vector<1x8x8xbf16>
      tpu.vector_store %arg14[%c2_75, %c0_76, %c0_77], %144 {strides = array<i32>} : memref<4x8x8xbf16, #tpu.memory_space<vmem>>, vector<1x8x8xbf16>,
      %145 = vector.extract_strided_slice %112 {offsets = [0, 16], sizes = [8, 8], strides = [1, 1]} : vector<8x32xbf16> to vector<8x8xbf16>
      %c2_78 = arith.constant 2 : index
      %c0_79 = arith.constant 0 : index
      %c0_80 = arith.constant 0 : index
      %146 = vector.load %arg15[%c2_78, %c0_79, %c0_80] : memref<4x8x8xbf16, #tpu.memory_space<vmem>>, vector<1x8x8xbf16>
      %147 = vector.shape_cast %146 : vector<1x8x8xbf16> to vector<8x8xbf16>
      %148 = vector.shape_cast %145 : vector<8x8xbf16> to vector<1x8x8xbf16>
      tpu.vector_store %arg15[%c2_78, %c0_79, %c0_80], %148 {strides = array<i32>} : memref<4x8x8xbf16, #tpu.memory_space<vmem>>, vector<1x8x8xbf16>,
      %149 = vector.extract_strided_slice %108 {offsets = [0, 24], sizes = [8, 8], strides = [1, 1]} : vector<8x32xbf16> to vector<8x8xbf16>
      %c3 = arith.constant 3 : index
      %c0_81 = arith.constant 0 : index
      %c0_82 = arith.constant 0 : index
      %150 = vector.load %arg13[%c3, %c0_81, %c0_82] : memref<4x8x8xbf16, #tpu.memory_space<vmem>>, vector<1x8x8xbf16>
      %151 = vector.shape_cast %150 : vector<1x8x8xbf16> to vector<8x8xbf16>
      %152 = vector.shape_cast %149 : vector<8x8xbf16> to vector<1x8x8xbf16>
      tpu.vector_store %arg13[%c3, %c0_81, %c0_82], %152 {strides = array<i32>} : memref<4x8x8xbf16, #tpu.memory_space<vmem>>, vector<1x8x8xbf16>,
      %153 = vector.extract_strided_slice %110 {offsets = [0, 24], sizes = [8, 8], strides = [1, 1]} : vector<8x32xbf16> to vector<8x8xbf16>
      %c3_83 = arith.constant 3 : index
      %c0_84 = arith.constant 0 : index
      %c0_85 = arith.constant 0 : index
      %154 = vector.load %arg14[%c3_83, %c0_84, %c0_85] : memref<4x8x8xbf16, #tpu.memory_space<vmem>>, vector<1x8x8xbf16>
      %155 = vector.shape_cast %154 : vector<1x8x8xbf16> to vector<8x8xbf16>
      %156 = vector.shape_cast %153 : vector<8x8xbf16> to vector<1x8x8xbf16>
      tpu.vector_store %arg14[%c3_83, %c0_84, %c0_85], %156 {strides = array<i32>} : memref<4x8x8xbf16, #tpu.memory_space<vmem>>, vector<1x8x8xbf16>,
      %157 = vector.extract_strided_slice %112 {offsets = [0, 24], sizes = [8, 8], strides = [1, 1]} : vector<8x32xbf16> to vector<8x8xbf16>
      %c3_86 = arith.constant 3 : index
      %c0_87 = arith.constant 0 : index
      %c0_88 = arith.constant 0 : index
      %158 = vector.load %arg15[%c3_86, %c0_87, %c0_88] : memref<4x8x8xbf16, #tpu.memory_space<vmem>>, vector<1x8x8xbf16>
      %159 = vector.shape_cast %158 : vector<1x8x8xbf16> to vector<8x8xbf16>
      %160 = vector.shape_cast %157 : vector<8x8xbf16> to vector<1x8x8xbf16>
      tpu.vector_store %arg15[%c3_86, %c0_87, %c0_88], %160 {strides = array<i32>} : memref<4x8x8xbf16, #tpu.memory_space<vmem>>, vector<1x8x8xbf16>,
    } else {
    }
    %c8_i32 = arith.constant 8 : i32
    %3 = arith.muli %arg1, %c8_i32 : i32
    %4 = tpu.assume_multiple %3, 8 : i32
    %c0 = arith.constant 0 : index
    %5 = arith.index_cast %4 : i32 to index
    %c0_1 = arith.constant 0 : index
    %6 = vector.load %arg13[%c0, %5, %c0_1] : memref<4x8x8xbf16, #tpu.memory_space<vmem>>, vector<4x8x8xbf16>
    %c0_2 = arith.constant 0 : index
    %c0_3 = arith.constant 0 : index
    %c0_4 = arith.constant 0 : index
    %7 = vector.load %arg14[%c0_2, %c0_3, %c0_4] : memref<4x8x8xbf16, #tpu.memory_space<vmem>>, vector<4x8x8xbf16>
    %c0_5 = arith.constant 0 : index
    %c0_6 = arith.constant 0 : index
    %c0_7 = arith.constant 0 : index
    %8 = vector.load %arg15[%c0_5, %c0_6, %c0_7] : memref<4x8x8xbf16, #tpu.memory_space<vmem>>, vector<4x8x8xbf16>
    "tpu.trace_start"() <{level = 10 : i32, message = "hqd,hkd->hqk"}> : () -> ()
    %cst = arith.constant dense<0.000000e+00> : vector<4x8x8xf32>
    %9 = tpu.matmul %6, %7, %cst {dimension_numbers = #tpu.dot_dimension_numbers<[2], [2], [1], [1], [0, 0, 0, 1, 1, 1], [0], [0]>} : vector<4x8x8xbf16>, vector<4x8x8xbf16>, vector<4x8x8xf32> -> vector<4x8x8xf32>
    "tpu.trace_stop"() : () -> ()
    %cst_8 = arith.constant dense<0xFF800000> : vector<4x8xf32>
    %10 = vector.multi_reduction <maximumf>, %9, %cst_8 [2] : vector<4x8x8xf32> to vector<4x8xf32>
    %11 = vector.shape_cast %10 : vector<4x8xf32> to vector<4x8x1xf32>
    %12 = vector.broadcast %11 : vector<4x8x1xf32> to vector<4x8x8xf32>
    %13 = arith.subf %9, %12 : vector<4x8x8xf32>
    %14 = math.exp %13 : vector<4x8x8xf32>
    %cst_9 = arith.constant dense<0.000000e+00> : vector<4x8xf32>
    %15 = vector.multi_reduction <add>, %14, %cst_9 [2] : vector<4x8x8xf32> to vector<4x8xf32>
    %16 = vector.shape_cast %15 : vector<4x8xf32> to vector<4x8x1xf32>
    %17 = arith.truncf %14 : vector<4x8x8xf32> to vector<4x8x8xbf16>
    "tpu.trace_start"() <{level = 10 : i32, message = "hqk,hkd->hqd"}> : () -> ()
    %cst_10 = arith.constant dense<0.000000e+00> : vector<4x8x8xf32>
    %18 = tpu.matmul %17, %8, %cst_10 {dimension_numbers = #tpu.dot_dimension_numbers<[2], [1], [1], [2], [0, 0, 0, 1, 1, 2], [0], [0]>} : vector<4x8x8xbf16>, vector<4x8x8xbf16>, vector<4x8x8xf32> -> vector<4x8x8xf32>
    "tpu.trace_stop"() : () -> ()
    %19 = tpu.reciprocal %16 {approx = true} : vector<4x8x1xf32> -> vector<4x8x1xf32>
    %20 = vector.broadcast %19 : vector<4x8x1xf32> to vector<4x8x8xf32>
    %21 = arith.mulf %18, %20 : vector<4x8x8xf32>
    %22 = arith.truncf %21 : vector<4x8x8xf32> to vector<4x8x8xbf16>
    %23 = vector.extract_strided_slice %22 {offsets = [0, 0, 0], sizes = [1, 8, 8], strides = [1, 1, 1]} : vector<4x8x8xbf16> to vector<1x8x8xbf16>
    %24 = vector.shape_cast %23 : vector<1x8x8xbf16> to vector<8x8xbf16>
    %c0_11 = arith.constant 0 : index
    %c0_12 = arith.constant 0 : index
    %25 = vector.load %arg16[%c0_11, %c0_12] : memref<8x32xbf16, #tpu.memory_space<vmem>>, vector<8x8xbf16>
    tpu.vector_store %arg16[%c0_11, %c0_12], %24 {strides = array<i32>} : memref<8x32xbf16, #tpu.memory_space<vmem>>, vector<8x8xbf16>,
    %26 = vector.extract_strided_slice %22 {offsets = [1, 0, 0], sizes = [1, 8, 8], strides = [1, 1, 1]} : vector<4x8x8xbf16> to vector<1x8x8xbf16>
    %27 = vector.shape_cast %26 : vector<1x8x8xbf16> to vector<8x8xbf16>
    %c0_13 = arith.constant 0 : index
    %c8 = arith.constant 8 : index
    %28 = vector.load %arg16[%c0_13, %c8] : memref<8x32xbf16, #tpu.memory_space<vmem>>, vector<8x8xbf16>
    tpu.vector_store %arg16[%c0_13, %c8], %27 {strides = array<i32>} : memref<8x32xbf16, #tpu.memory_space<vmem>>, vector<8x8xbf16>,
    %29 = vector.extract_strided_slice %22 {offsets = [2, 0, 0], sizes = [1, 8, 8], strides = [1, 1, 1]} : vector<4x8x8xbf16> to vector<1x8x8xbf16>
    %30 = vector.shape_cast %29 : vector<1x8x8xbf16> to vector<8x8xbf16>
    %c0_14 = arith.constant 0 : index
    %c16 = arith.constant 16 : index
    %31 = vector.load %arg16[%c0_14, %c16] : memref<8x32xbf16, #tpu.memory_space<vmem>>, vector<8x8xbf16>
    tpu.vector_store %arg16[%c0_14, %c16], %30 {strides = array<i32>} : memref<8x32xbf16, #tpu.memory_space<vmem>>, vector<8x8xbf16>,
    %32 = vector.extract_strided_slice %22 {offsets = [3, 0, 0], sizes = [1, 8, 8], strides = [1, 1, 1]} : vector<4x8x8xbf16> to vector<1x8x8xbf16>
    %33 = vector.shape_cast %32 : vector<1x8x8xbf16> to vector<8x8xbf16>
    %c0_15 = arith.constant 0 : index
    %c24 = arith.constant 24 : index
    %34 = vector.load %arg16[%c0_15, %c24] : memref<8x32xbf16, #tpu.memory_space<vmem>>, vector<8x8xbf16>
    tpu.vector_store %arg16[%c0_15, %c24], %33 {strides = array<i32>} : memref<8x32xbf16, #tpu.memory_space<vmem>>, vector<8x8xbf16>,
    %c0_16 = arith.constant 0 : index
    %c0_17 = arith.constant 0 : index
    %35 = vector.load %arg16[%c0_16, %c0_17] : memref<8x32xbf16, #tpu.memory_space<vmem>>, vector<8x32xbf16>
    %c0_18 = arith.constant 0 : index
    %c0_19 = arith.constant 0 : index
    %36 = vector.load %arg7[%c0_18, %c0_19] : memref<32x32xbf16, #tpu.memory_space<vmem>>, vector<32x32xbf16>
    %cst_20 = arith.constant dense<0.000000e+00> : vector<8x32xf32>
    %37 = tpu.matmul %35, %36, %cst_20 {dimension_numbers = #tpu.dot_dimension_numbers<[1], [0], [0], [1], [0, 0, 1, 1], [], []>} : vector<8x32xbf16>, vector<32x32xbf16>, vector<8x32xf32> -> vector<8x32xf32>
    %c0_21 = arith.constant 0 : index
    %c0_22 = arith.constant 0 : index
    %38 = vector.load %arg8[%c0_21, %c0_22] : memref<1x32xf32, #tpu.memory_space<vmem>>, vector<1x32xf32>
    %39 = vector.broadcast %38 : vector<1x32xf32> to vector<8x32xf32>
    %40 = arith.addf %37, %39 : vector<8x32xf32>
    %41 = arith.index_cast %4 : i32 to index
    %c0_23 = arith.constant 0 : index
    %42 = vector.load %arg12[%41, %c0_23] : memref<8x32xbf16, #tpu.memory_space<vmem>>, vector<8x32xbf16>
    %43 = arith.extf %42 : vector<8x32xbf16> to vector<8x32xf32>
    %44 = arith.addf %40, %43 : vector<8x32xf32>
    %c0_24 = arith.constant 0 : index
    %c0_25 = arith.constant 0 : index
    %45 = vector.load %arg9[%c0_24, %c0_25] : memref<1x32xf32, #tpu.memory_space<vmem>>, vector<1x32xf32>
    %c0_26 = arith.constant 0 : index
    %c0_27 = arith.constant 0 : index
    %46 = vector.load %arg10[%c0_26, %c0_27] : memref<1x32xf32, #tpu.memory_space<vmem>>, vector<1x32xf32>
    %cst_28 = arith.constant dense<0.000000e+00> : vector<8xf32>
    %47 = vector.multi_reduction <add>, %44, %cst_28 [1] : vector<8x32xf32> to vector<8xf32>
    %48 = vector.shape_cast %47 : vector<8xf32> to vector<8x1xf32>
    %cst_29 = arith.constant 3.200000e+01 : f32
    %49 = vector.broadcast %cst_29 : f32 to vector<8x1xf32>
    %50 = arith.divf %48, %49 : vector<8x1xf32>
    %51 = vector.broadcast %50 : vector<8x1xf32> to vector<8x32xf32>
    %52 = arith.subf %44, %51 : vector<8x32xf32>
    %53 = arith.mulf %52, %52 : vector<8x32xf32>
    %cst_30 = arith.constant dense<0.000000e+00> : vector<8xf32>
    %54 = vector.multi_reduction <add>, %53, %cst_30 [1] : vector<8x32xf32> to vector<8xf32>
    %55 = vector.shape_cast %54 : vector<8xf32> to vector<8x1xf32>
    %cst_31 = arith.constant 3.200000e+01 : f32
    %56 = vector.broadcast %cst_31 : f32 to vector<8x1xf32>
    %57 = arith.divf %55, %56 : vector<8x1xf32>
    %58 = vector.broadcast %50 : vector<8x1xf32> to vector<8x32xf32>
    %59 = arith.subf %44, %58 : vector<8x32xf32>
    %cst_32 = arith.constant 9.99999974E-6 : f32
    %60 = vector.broadcast %cst_32 : f32 to vector<8x1xf32>
    %61 = arith.addf %57, %60 : vector<8x1xf32>
    %62 = math.rsqrt %61 : vector<8x1xf32>
    %63 = vector.broadcast %62 : vector<8x1xf32> to vector<8x32xf32>
    %64 = arith.mulf %59, %63 : vector<8x32xf32>
    %65 = vector.broadcast %45 : vector<1x32xf32> to vector<8x32xf32>
    %66 = arith.mulf %64, %65 : vector<8x32xf32>
    %67 = vector.broadcast %46 : vector<1x32xf32> to vector<8x32xf32>
    %68 = arith.addf %66, %67 : vector<8x32xf32>
    %c0_33 = arith.constant 0 : index
    %c0_34 = arith.constant 0 : index
    %c0_35 = arith.constant 0 : index
    %69 = vector.load %arg11[%c0_33, %c0_34, %c0_35] : memref<1x8x32xf32, #tpu.memory_space<vmem>>, vector<1x8x32xf32>
    %70 = vector.shape_cast %69 : vector<1x8x32xf32> to vector<8x32xf32>
    %71 = vector.shape_cast %68 : vector<8x32xf32> to vector<1x8x32xf32>
    tpu.vector_store %arg11[%c0_33, %c0_34, %c0_35], %71 {strides = array<i32>} : memref<1x8x32xf32, #tpu.memory_space<vmem>>, vector<1x8x32xf32>,
    return
  }
  func.func @transform_0(%arg0: i32, %arg1: i32) -> (i32, i32, i32) {
    %c0_i32 = arith.constant 0 : i32
    %c0_i32_0 = arith.constant 0 : i32
    %c0_i32_1 = arith.constant 0 : i32
    return %arg0, %c0_i32, %c0_i32_0 : i32, i32, i32
  }
  func.func @transform_1(%arg0: i32, %arg1: i32) -> (i32, i32) {
    %c0_i32 = arith.constant 0 : i32
    %c0_i32_0 = arith.constant 0 : i32
    %c0_i32_1 = arith.constant 0 : i32
    return %c0_i32, %c0_i32_0 : i32, i32
  }
  func.func @transform_2(%arg0: i32, %arg1: i32) -> (i32, i32) {
    %c0_i32 = arith.constant 0 : i32
    %c0_i32_0 = arith.constant 0 : i32
    %c0_i32_1 = arith.constant 0 : i32
    return %c0_i32, %c0_i32_0 : i32, i32
  }
  func.func @transform_3(%arg0: i32, %arg1: i32) -> (i32, i32) {
    %c0_i32 = arith.constant 0 : i32
    %c0_i32_0 = arith.constant 0 : i32
    %c0_i32_1 = arith.constant 0 : i32
    return %c0_i32, %c0_i32_0 : i32, i32
  }
  func.func @transform_4(%arg0: i32, %arg1: i32) -> (i32, i32) {
    %c0_i32 = arith.constant 0 : i32
    %c0_i32_0 = arith.constant 0 : i32
    %c0_i32_1 = arith.constant 0 : i32
    return %c0_i32, %c0_i32_0 : i32, i32
  }
  func.func @transform_5(%arg0: i32, %arg1: i32) -> (i32, i32) {
    %c0_i32 = arith.constant 0 : i32
    %c0_i32_0 = arith.constant 0 : i32
    %c0_i32_1 = arith.constant 0 : i32
    return %c0_i32, %c0_i32_0 : i32, i32
  }
  func.func @transform_6(%arg0: i32, %arg1: i32) -> (i32, i32) {
    %c0_i32 = arith.constant 0 : i32
    %c0_i32_0 = arith.constant 0 : i32
    %c0_i32_1 = arith.constant 0 : i32
    return %c0_i32, %c0_i32_0 : i32, i32
  }
  func.func @transform_7(%arg0: i32, %arg1: i32) -> (i32, i32) {
    %c0_i32 = arith.constant 0 : i32
    %c0_i32_0 = arith.constant 0 : i32
    %c0_i32_1 = arith.constant 0 : i32
    return %c0_i32, %c0_i32_0 : i32, i32
  }
  func.func @transform_8(%arg0: i32, %arg1: i32) -> (i32, i32) {
    %c0_i32 = arith.constant 0 : i32
    %c0_i32_0 = arith.constant 0 : i32
    %c0_i32_1 = arith.constant 0 : i32
    return %c0_i32, %c0_i32_0 : i32, i32
  }
  func.func @transform_9(%arg0: i32, %arg1: i32) -> (i32, i32, i32) {
    %c0_i32 = arith.constant 0 : i32
    %c0_i32_0 = arith.constant 0 : i32
    return %arg0, %arg1, %c0_i32 : i32, i32, i32
  }
}

</mosaic_0001>

<bundles_post_ra>
// kernel: tpu_custom_call.1
= control target key start
LH: loop header
LB: loop body
LE: loop exit
PB: predicated region body
PF: predicated region fallthrough
CT: control target
= control target key end

     0   :  { %s1699_s0 = inlined_call_operand.hbm [shape: f32[2,8,32], index: 0, kind: input, shape index: {}]   ;;  %s1700_s1 = inlined_call_operand.hbm [shape: f32[1,32], index: 1, kind: input, shape index: {}]   ;;  %s1701_s2 = inlined_call_operand.vmem [shape: f32[1,32], index: 2, kind: input, shape index: {}]   ;;  %s1702_s3 = inlined_call_operand.hbm [shape: bf16[32,96], index: 3, kind: input, shape index: {}]   ;;  %s1703_s4 = inlined_call_operand.vmem [shape: f32[1,96], index: 4, kind: input, shape index: {}]   ;;  %s1704_s5 = inlined_call_operand.hbm [shape: bf16[32,32], index: 5, kind: input, shape index: {}]   ;;  %s1705_s6 = inlined_call_operand.vmem [shape: f32[1,32], index: 6, kind: input, shape index: {}]   ;;  %s1706_s7 = inlined_call_operand.vmem [shape: f32[1,32], index: 7, kind: input, shape index: {}]   ;;  %s1707_s8 = inlined_call_operand.vmem [shape: f32[1,32], index: 8, kind: input, shape index: {}]   ;;  %s1708_s9 = inlined_call_operand.hbm [shape: f32[2,8,32], index: 9, kind: output, shape index: {}]  }
   0x1   :  { %1717 = sst [smem:[#allocation27_spill]] %s1700_s1 }
   0x2   :  { %14 = vsyncpa [#allocation8], 0 }
   0x3   :  { %15 = vsyncpa [#allocation11], 0 }
   0x4   :  { %16 = vsyncpa [#allocation14], 0 }
   0x5   :  { %17 = vsyncpa [#allocation9], 0 }
   0x6   :  { %19 = vsyncpa [#allocation9 + $0x1], 0  ;;  %s1452_s30 = smov 0   ;;  %s1454_s10 = smov 0  }
   0x7   :  { %s1456_s11 = smov 0   ;;  %s1458_s12 = smov 0  }
   0x8   :  { %s1460_s13 = smov 0   ;;  %s1462_s14 = smov 0  }
   0x9 LB: > { %1718 = sst [smem:[#allocation20_spill]] %s1359_s30  ;;  %s986_s18 = sadd.s32 4294967295, %s1379_s14   ;;  %s1379_s14 = sphi %s1462_s14, %s25_s14   ;;  %s1375_s13 = sphi %s1460_s13, %s1741_s13   ;;  %s1371_s12 = sphi %s1458_s12, %s1740_s12   ;;  %s1367_s11 = sphi %s1456_s11, %s1739_s11   ;;  %s1363_s10 = sphi %s1454_s10, %s1743_s10   ;;  %s1359_s30 = sphi %s1452_s30, %s1742_s30  }
   0xa   : > { %1719 = sst [smem:[#allocation21_spill]] %s1367_s11  ;;  %p988_p0 = scmp.ge.s32.totalorder %s1379_s14, 1 }
   0xb   : > { %1720 = sst [smem:[#allocation22_spill]] %s1375_s13  ;;  %p1487_p1 = scmp.eq.s32.totalorder %s986_s18, 0 }
   0xc   : > { %1721 = sst [smem:[#allocation23_spill]] %s1379_s14  ;;  %p264_p2 = scmp.lt.s32.totalorder %s1379_s14, 3 }
   0xd   : > { %s1722_s1 = sld [smem:[#allocation27_spill]]  ;;  %s1381_s21 = smov [#allocation10]  }
   0xe   : > { %p1492_p3 = pnand %p988_p0, %p264_p2  ;;  %s292_s22 = sshll.u32 %s1381_s21, 4  ;;  %s293_s22 = int_to_ptr.vmem [resolvable:$true] %s292_s22 }
   0xf   : > { %s987_s24 = sadd.s32 4294967294, %s1379_s14   ;;  %s37_s25 = sadd.s32 1, %s1375_s13 }
  0x10   : > { %p1048_p4 = pneg %p1492_p3  ;;  %p39_p6 = scmp.ge.s32.totalorder %s37_s25, 2 }
  0x11   : > { %s44_s26 = sadd.s32 1, %s1367_s11  ;;  %p57_p7 = scmp.ne.s32.totalorder %s1363_s10, %s1359_s30 }
  0x12   : > { %p1503_p5 = pnand %p1048_p4, %p1487_p1  ;;  %p250_p8 = scmp.ne.s32.totalorder %s1367_s11, %s1363_s10 }
  0x13   : > { %s290_s17 = sshll.u32 %s1722_s1, 4  ;;  %s1745_s25 = smov (%p39_p6, %s37_s25), 0  ;;  %s291_s17 = int_to_ptr.hbm [resolvable:$true] %s290_s17 }
  0x14   : > { %1054 = dma.hbm_to_vmem [thread:$0]  (!%p1503_p5), %s291_s17, 16, %s293_s22, [#allocation11]  }
  0x15   : > { %1726 = sst [smem:[#allocation24_spill]] %s1745_s25  ;;  %p1520_p9 = por %p1487_p1, %p57_p7 }
  0x16   : > { %p251_p10 = scmp.eq.s32.totalorder %s986_s18, 1  ;;  %s41_s28 = ssub.s32 %s1375_s13, %s1745_s25 }
  0x17   : > { %p257_p11 = scmp.eq.s32.totalorder %s987_s24, 1  ;;  %p42_p12 = scmp.eq.s32.totalorder %s41_s28, 0 }
  0x18   : > { %p1526_p13 = por %p251_p10, %p250_p8  ;;  %s1711_s16 = sshll.u32 %s1371_s12, 3 }
  0x19   : > { %p1530_p0 = por %p257_p11, %p57_p7  ;;  %s276_s1 = scalar_lea.hbm %s1699_s0, %s1711_s16 }
  0x1a   : > { %s1536_s17 = scalar_select %p42_p12, %s1367_s11, %s44_s26  }
  0x1b   : > { %s1729_s15 = scalar_select %p1530_p0, 1, 0 }
  0x1c   : > { %1731 = sst [smem:[#allocation26_spill]] %s1536_s17  ;;  %s278_s18 = sshll.u32 %s276_s1, 4  ;;  %s279_s18 = int_to_ptr.hbm [resolvable:$true] %s278_s18 }
  0x1d   : > { %1730 = sst [smem:[#allocation25_spill]] %s1729_s15  ;;  %s1382_s25 = smov [#allocation7]  }
  0x1e   : > { %s280_s24 = sshll.u32 %s1382_s25, 4  ;;  %p1548_p2 = pnand %p1048_p4, %p1520_p9  ;;  %s281_s24 = int_to_ptr.vmem [resolvable:$true] %s280_s24 }
  0x1f   : > { %s304_s17 = sshll.u32 %s1702_s3, 4  ;;  %s1383_s21 = smov [#allocation12]   ;;  %s305_s17 = int_to_ptr.hbm [resolvable:$true] %s304_s17 }
  0x20   : > { %s306_s22 = sshll.u32 %s1383_s21, 4  ;;  %s1199_s1 = sshra.s32 %s279_s18, 4  ;;  %s1200_s1 = int_to_ptr.hbm [resolvable:$true] %s1199_s1  ;;  %s307_s22 = int_to_ptr.vmem [resolvable:$true] %s306_s22 }
  0x21   : > { %s1201_s25 = scalar_lea.hbm %s1200_s1, 8  ;;  %p1203_p7 = pneg %p1548_p2 }
  0x22   : > { %p1202_p6 = scmp.ne.s32.totalorder %s1200_s1, %s1201_s25  ;;  %s1206_s15 = scalar_lea.hbm %s1699_s0, 16 }
  0x23   : > { %p1207_p4 = scmp.lt.s32.totalorder %s1200_s1, %s1699_s0  ;;  %p1208_p11 = scmp.lt.s32.totalorder %s1206_s15, %s1201_s25 }
  0x24   : > { %p1204_p8 = pnand %p1203_p7, %p1202_p6 }
  0x25   : > { %p1209_p12 = por %p1208_p11, %p1207_p4 }
  0x26   : > { %p1205_p10 = pneg %p1204_p8 }
  0x28   : > { %p1210_p0 = pnand %p1209_p12, %p1205_p10 }
  0x2a   : > { %1213 = shalt.err (!%p1210_p0)
}
  0x2b   : > { %1051 = dma.hbm_to_vmem [thread:$0]  (!%p1548_p2), %s279_s18, 128, %s281_s24, [#allocation8]  }
  0x2c   : > { %s321_s21 = sshll.u32 %s1704_s5, 4  ;;  %s1384_s11 = smov 64   ;;  %s322_s21 = int_to_ptr.hbm [resolvable:$true] %s321_s21 }
  0x2d   : > { %s1385_s16 = smov 4   ;;  %s1386_s30 = smov [#allocation13]  }
  0x2e   : > { %1057 = dma.hbm_to_vmem [thread:$0]  (!%p1503_p5), %s305_s17, 256, %s307_s22, [#allocation11], %s1384_s11, %s1384_s11, %s1385_s16  }
  0x2f   : > { %s323_s14 = sshll.u32 %s1386_s30, 4  ;;  %348 = sbr.rel (%p1492_p3) target bundleno = 1521 (0x5f1), region = 56  ;;  %s324_s14 = int_to_ptr.vmem [resolvable:$true] %s323_s14 }
  0x30   : > { %1060 = dma.hbm_to_vmem [thread:$0]  (!%p1503_p5), %s322_s21, 256, %s324_s14, [#allocation14], %s1384_s11, %s1384_s11, %s1385_s16  }
  0x34   : > { %1342 = dma.done.wait (%p1520_p9), [#allocation8], 128  }
  0x35   : > { %1344 = vsyncadd (%p1520_p9), [#allocation8], 4294967168 }
  0x36   : > { %1346 = dma.done.wait (%p1487_p1), [#allocation11], 272  }
  0x37   : > { %1348 = vsyncadd (%p1487_p1), [#allocation11], 4294967024 }
  0x38   : > { %1350 = dma.done.wait (%p1487_p1), [#allocation14], 256  }
  0x39   : > { %1352 = vsyncadd (%p1487_p1), [#allocation14], 4294967040  ;;  %vm403_vm0 = vcmask 261120   ;;  %v400_v0 = vld [vmem:[#allocation7] sm:$0xff]  ;;  %v1387_v2 = vmov 32.0   ;;  %v1029_v14 = vld [vmem:[#allocation12 + $0x8] sm:$0xff] }
  0x3a   : > { %v404_v1 = vsel %vm403_vm0, %v400_v0, 0.0  ;;  %1147 = vrcp.f32 %v1387_v2  ;;  %473 = vmatpush.bf16.msra.mxu0 %v1029_v14  ;;  %v1028_v15 = vld [vmem:[#allocation12] sm:$0xff]  ;;  %v1141_v25 = vld [vmem:[#allocation10] ss:$0 sm:$0xff]  ;;  %vm442_vm5 = vcmask 257024   ;;  %vm483_vm6 = vcmask 60416  }
  0x3b   : > { %405 = vadd.xlane.f32.xlu0 %v404_v1  ;;  %v1142_v28 = vld [vmem:[%s1701_s2] ss:$0 sm:$0xff]  ;;  %s1388_s15 = smov 72   ;;  %s1389_s17 = smov 88   ;;  %vm557_vm7 = vcmask 64512   ;;  %vm677_vm8 = vcmask 1043456  }
  0x3c   : > { %v1143_v32 = vld [vmem:[%s1703_s4] ss:$0 sm:$0xff]  ;;  %s1390_s18 = smov 120   ;;  %s1391_s24 = smov 56   ;;  %vm769_vm9 = vcmask 126016   ;;  %vm775_vm10 = vcmask 191616  }
  0x3d   : > { %s1392_s28 = smov 80   ;;  %s1393_s22 = smov 112   ;;  %vm781_vm11 = vcmask 257216  }
  0x3e   : > { %474 = vmatpush.bf16.msra.mxu0 %v1028_v15  ;;  %s1394_s1 = smov 48   ;;  %s1395_s25 = smov 104  }
  0x3f   : > { %s1396_s13 = smov 96   ;;  %s1397_s26 = smov 40  }
  0x40   : > { %v1148_v3 = vpop.eup %1147  ;;  %s1398_s21 = smov 64   ;;  %s1399_s11 = smov 8  }
  0x41   : > { %v408_v4 = vmul.f32 32.0, %v1148_v3  ;;  %vm412_vm1 = vweird.f32 %v1148_v3  ;;  %s1400_s16 = smov 16   ;;  %s1401_s30 = smov 24  }
  0x42   : > { %s392_s20 = sand.u32 1, %s1363_s10   ;;  %s1309_s14 = scalar_lea.hbm %s1708_s9, 16 }
  0x43   : > { %v409_v5 = vsub.f32 1.0, %v408_v4  ;;  %s997_s23 = sshll.u32 %s392_s20, 3 }
  0x45   : > { %v410_v6 = vmul.f32 %v1148_v3, %v409_v5 }
  0x47   : > { %v411_v7 = vadd.f32 %v1148_v3, %v410_v6 }
  0x49   : > { %v1587_v8 = vsel %vm412_vm1, %v1148_v3, %v411_v7 }
  0xae   : > { %v406_v9 = vpop.xlane.xlu0 %405 }
  0xaf   : > { %v414_v10 = vmul.f32 %v1587_v8, %v406_v9 }
  0xb1   : > { %v415_v11 = vsub.f32 %v400_v0, %v414_v10 }
  0xb3   : > { %v416_v12 = vmul.f32 %v415_v11, %v415_v11 }
  0xb5   : > { %v417_v13 = vsel %vm403_vm0, %v416_v12, 0.0 }
  0xb6   : > { %418 = vadd.xlane.f32.xlu0 %v417_v13 }
 0x129   : > { %v419_v16 = vpop.xlane.xlu0 %418 }
 0x12a   : > { %v420_v17 = vmul.f32 %v419_v16, %v1587_v8 }
 0x12c   : > { %v421_v18 = vadd.f32 1e-05, %v420_v17 }
 0x12e   : > { %1149 = vrsqrt.f32 %v421_v18  ;;  %vm428_vm3 = vweird.f32 %v421_v18 }
 0x134   : > { %v1150_v19 = vpop.eup %1149 }
 0x135   : > { %v423_v20 = vmul.f32 %v1150_v19, %v421_v18  ;;  %vm429_vm2 = vweird.f32 %v1150_v19 }
 0x136   : > { %vm430_vm4 = vmor %vm428_vm3, %vm429_vm2 }
 0x137   : > { %v424_v21 = vmul.f32 %v1150_v19, %v423_v20 }
 0x139   : > { %v425_v22 = vmul.f32 0.5, %v424_v21 }
 0x13b   : > { %v426_v23 = vsub.f32 1.5, %v425_v22 }
 0x13d   : > { %v427_v24 = vmul.f32 %v1150_v19, %v426_v23 }
 0x13f   : > { %v431_v26 = vsel %vm430_vm4, %v1150_v19, %v427_v24 }
 0x140   : > { %v432_v27 = vmul.f32 %v431_v26, %v415_v11 }
 0x142   : > { %v436_v29 = vmul.f32 %v1141_v25, %v432_v27 }
 0x144   : > { %v440_v30 = vadd.f32 %v1142_v28, %v436_v29 }
 0x146   : > { %v441_v31 = vpack.c.bf16 %v440_v30, %v440_v30 }
 0x148   : > { %443 = vst.msk [vmem:[#allocation2] sm:$0xf] %vm442_vm5, %v441_v31  ;;  %1006 = vmatmul.msk.bf16.vlgmr.msra.gmra.mxu0 %vm403_vm0, %v441_v31 }
 0x1c5   : > { %v476_v33 = vpop.f32.mrf.mxu0 }
 0x1c6   : > { %v477_v34 = vadd.f32 %v1143_v32, %v476_v33 }
 0x1c8   : > { %v480_v35 = vmul.f32 0.35355338, %v477_v34  ;;  %v1599_v36 = vpack.c.bf16 %v477_v34, %v477_v34 }
 0x1ca   : > { %v481_v37 = vpack.c.bf16 %v480_v35, %v480_v35  ;;  %530 = vrot.lane.b32.xlu0 %v1599_v36, %s1388_s15  ;;  %500 = vrot.lane.b32.xlu1 %v1599_v36, %s1389_s17  ;;  %s1733_s17 = sshll.u32 %s1371_s12, 3  ;;  %s867_s12 = scalar_lea.sflag [#allocation9], %s392_s20 }
 0x1cc   : > { %484 = vst.msk [vmem:[#allocation3] sm:$0xf] %vm483_vm6, %v481_v37  ;;  %495 = vrot.lane.b32.xlu2 %v481_v37, %s1390_s18 }
 0x1cd   : > { %v478_v38 = vpop.f32.mrf.mxu0 }
 0x1d2   : > { %505 = vrot.lane.b32.xlu0 %v1599_v36, %s1391_s24  ;;  %515 = vrot.lane.b32.xlu1 %v1599_v36, %s1392_s28  ;;  %s878_s28 = scalar_lea.hbm %s1708_s9, %s1733_s17 }
 0x1d3   : > { %v545_v52 = vld [vmem:[#allocation3] sm:$0xf] }
 0x1d4   : > { %510 = vrot.lane.b32.xlu2 %v481_v37, %s1393_s22 }
 0x1da   : > { %520 = vrot.lane.b32.xlu0 %v1599_v36, %s1394_s1  ;;  %525 = vrot.lane.b32.xlu1 %v481_v37, %s1395_s25  ;;  %s394_s25 = scalar_lea.vmem [#allocation15], %s997_s23 }
 0x1dc   : > { %486 = vrot.lane.b32.xlu2 %v1599_v36, %s1396_s13  ;;  %s880_s13 = sshll.u32 %s394_s25, 4  ;;  %s881_s13 = int_to_ptr.vmem [resolvable:$true] %s880_s13 }
 0x226   : > { %v496_v39 = vpop.permute.xlu2 %495 }
 0x227   : > { %499 = vst.msk [vmem:[#allocation3 + $0x4] sm:$0xf] %vm483_vm6, %v496_v39 }
 0x22e   : > { %v511_v40 = vpop.permute.xlu2 %510  ;;  %v546_v55 = vld [vmem:[#allocation3 + $0x4] sm:$0xf] }
 0x22f   : > { %514 = vst.msk [vmem:[#allocation3 + $0x8] sm:$0xf] %vm483_vm6, %v511_v40 }
 0x236   : > { %v487_v41 = vpop.permute.xlu2 %486  ;;  %v547_v61 = vld [vmem:[#allocation3 + $0x8] sm:$0xf] }
 0x237   : > { %489 = vst.msk [vmem:[#allocation4] sm:$0xf] %vm483_vm6, %v487_v41 }
 0x23c   : > { %v531_v42 = vpop.permute.xlu0 %530  ;;  %v501_v43 = vpop.permute.xlu1 %500 }
 0x23d   : > { %534 = vst.msk [vmem:[#allocation4 + $0xc] sm:$0xf] %vm483_vm6, %v531_v42 }
 0x23e   : > { %504 = vst.msk [vmem:[#allocation4 + $0x4] sm:$0xf] %vm483_vm6, %v501_v43  ;;  %v549_v44 = vld [vmem:[#allocation4] sm:$0xf] }
 0x23f   : > { %v562_v45 = vsel %vm557_vm7, %v549_v44, 0 }
 0x240   : > { %571 = vmatpush.bf16.xpose.msra.mxu1 %v562_v45 }
 0x244   : > { %v506_v46 = vpop.permute.xlu0 %505  ;;  %v516_v47 = vpop.permute.xlu1 %515  ;;  %v552_v48 = vld [vmem:[#allocation4 + $0xc] sm:$0xf] }
 0x245   : > { %509 = vst.msk [vmem:[#allocation5 + $0x4] sm:$0xf] %vm483_vm6, %v506_v46  ;;  %v550_v49 = vld [vmem:[#allocation4 + $0x4] sm:$0xf]  ;;  %v619_v50 = vsel %vm557_vm7, %v552_v48, 0 }
 0x246   : > { %519 = vst.msk [vmem:[#allocation4 + $0x8] sm:$0xf] %vm483_vm6, %v516_v47  ;;  %v581_v51 = vsel %vm557_vm7, %v550_v49, 0  ;;  %628 = vmatpush.bf16.xpose.msrb.mxu0 %v619_v50 }
 0x247   : > { %590 = vmatpush.bf16.xpose.msra.mxu2 %v581_v51  ;;  %1007 = vmatmul.msk.bf16.vlgmr.msra.gmra.mxu1 %vm557_vm7, %v545_v52 }
 0x24c   : > { %v521_v53 = vpop.permute.xlu0 %520  ;;  %v526_v54 = vpop.permute.xlu1 %525  ;;  %v554_v56 = vld [vmem:[#allocation5 + $0x4] sm:$0xf] }
 0x24d   : > { %524 = vst.msk [vmem:[#allocation5 + $0x8] sm:$0xf] %vm483_vm6, %v521_v53  ;;  %v551_v57 = vld [vmem:[#allocation4 + $0x8] sm:$0xf]  ;;  %v698_v58 = vsel %vm677_vm8, %v554_v56, 0 }
 0x24e   : > { %529 = vst.msk [vmem:[#allocation3 + $0xc] sm:$0xf] %vm483_vm6, %v526_v54  ;;  %1008 = vmatmul.msk.bf16.vlgmr.msra.gmra.mxu2 %vm557_vm7, %v546_v55  ;;  %v600_v59 = vsel %vm557_vm7, %v551_v57, 0 }
 0x24f   : > { %609 = vmatpush.bf16.xpose.msra.mxu3 %v600_v59  ;;  %707 = vmatpush.bf16.msrb.mxu2 %v698_v58 }
 0x254   : > { %v555_v60 = vld [vmem:[#allocation5 + $0x8] sm:$0xf] }
 0x255   : > { %v548_v62 = vld [vmem:[#allocation3 + $0xc] sm:$0xf]  ;;  %v717_v63 = vsel %vm677_vm8, %v555_v60, 0 }
 0x256   : > { %1009 = vmatmul.msk.bf16.vlgmr.msra.gmra.mxu3 %vm557_vm7, %v547_v61  ;;  %1010 = vmatmul.msk.bf16.vlgmr.msrb.gmra.mxu0 %vm557_vm7, %v548_v62 }
 0x257   : > { %726 = vmatpush.bf16.msrb.mxu3 %v717_v63 }
 0x2c4   : > { %v573_v0 = vpop.f32.mrf.mxu1 }
 0x2c5   : > { %v634_v10 = vsel %vm557_vm7, %v573_v0, -inf }
 0x2cc   : > { %v575_v1 = vpop.f32.mrf.mxu1 }
 0x2d1   : > { %v592_v2 = vpop.f32.mrf.mxu2 }
 0x2d2   : > { %v637_v3 = vsel %vm557_vm7, %v592_v2, -inf }
 0x2d3   : > { %v630_v4 = vpop.f32.mrf.mxu0  ;;  %638 = vmax.xlane.f32.xlu1 %v637_v3  ;;  %v1031_v3 = vld [vmem:[#allocation13 + $0x8] sm:$0xff] }
 0x2d4   : > { %v643_v5 = vsel %vm557_vm7, %v630_v4, -inf }
 0x2d5   : > { %644 = vmax.xlane.f32.xlu0 %v643_v5 }
 0x2d9   : > { %v594_v6 = vpop.f32.mrf.mxu2  ;;  %v611_v7 = vpop.f32.mrf.mxu3 }
 0x2da   : > { %v640_v9 = vsel %vm557_vm7, %v611_v7, -inf }
 0x2db   : > { %v632_v11 = vpop.f32.mrf.mxu0  ;;  %641 = vmax.xlane.f32.xlu2 %v640_v9  ;;  %635 = vmax.xlane.f32.xlu1 %v634_v10  ;;  %v1144_v10 = vld [vmem:[%s1705_s6] ss:$0 sm:$0xff] }
 0x2dc   : > { %v823_v11 = vld [vmem:[#allocation2] sm:$0xf] }
 0x2e1   : > { %v613_v12 = vpop.f32.mrf.mxu3 }
 0x2f3   : > { %535 = vrot.lane.b32.xlu2 %v1599_v36, %s1397_s26  ;;  %s882_s26 = sshll.u32 %s878_s28, 4  ;;  %s883_s26 = int_to_ptr.hbm [resolvable:$true] %s882_s26 }
 0x2f4   : > { %490 = vrot.lane.b32.xlu1 %v1599_v36, %s1398_s21  ;;  %s1303_s21 = sshra.s32 %s883_s26, 4  ;;  %s1304_s21 = int_to_ptr.hbm [resolvable:$true] %s1303_s21 }
 0x2f5   : > { %p1310_p9 = scmp.lt.s32.totalorder %s1304_s21, %s1708_s9 }
 0x346   : > { %v639_v13 = vpop.xlane.xlu1 %638 }
 0x347   : > { %v647_v14 = vsub.f32 %v592_v2, %v639_v13 }
 0x348   : > { %v645_v15 = vpop.xlane.xlu0 %644 }
 0x349   : > { %v652_v16 = vmul.f32 1.442695, %v647_v14  ;;  %v649_v17 = vsub.f32 %v630_v4, %v645_v15  ;;  %v1030_v4 = vld [vmem:[#allocation13] sm:$0xff]  ;;  %v824_v14 = vunpack.c.l.bf16 %v823_v11 }
 0x34b   : > { %1151 = vpow2.f32 %v652_v16  ;;  %v656_v18 = vmul.f32 1.442695, %v649_v17 }
 0x34d   : > { %1153 = vpow2.f32 %v656_v18 }
 0x34e   : > { %v642_v19 = vpop.xlane.xlu2 %641  ;;  %v636_v20 = vpop.xlane.xlu1 %635 }
 0x34f   : > { %v648_v21 = vsub.f32 %v611_v7, %v642_v19  ;;  %v646_v24 = vsub.f32 %v573_v0, %v636_v20 }
 0x351   : > { %v1152_v22 = vpop.eup %1151  ;;  %v654_v23 = vmul.f32 1.442695, %v648_v21  ;;  %v650_v29 = vmul.f32 1.442695, %v646_v24 }
 0x352   : > { %v661_v25 = vsel %vm557_vm7, %v1152_v22, 0.0  ;;  %v671_v26 = vpack.c.bf16 %v1152_v22, %v1152_v22 }
 0x353   : > { %v1154_v27 = vpop.eup %1153  ;;  %1155 = vpow2.f32 %v654_v23  ;;  %662 = vadd.xlane.f32.xlu2 %v661_v25 }
 0x354   : > { %1012 = vmatmul.msk.bf16.vlgmr.msrb.gmra.mxu2 %vm557_vm7, %v671_v26  ;;  %v667_v28 = vsel %vm557_vm7, %v1154_v27, 0.0  ;;  %1157 = vpow2.f32 %v650_v29  ;;  %v673_v37 = vpack.c.bf16 %v1154_v27, %v1154_v27 }
 0x355   : > { %668 = vadd.xlane.f32.xlu1 %v667_v28 }
 0x356   : > { %v536_v30 = vpop.permute.xlu2 %535 }
 0x357   : > { %539 = vst.msk [vmem:[#allocation5 + $0xc] sm:$0xf] %vm483_vm6, %v536_v30 }
 0x359   : > { %v1156_v31 = vpop.eup %1155 }
 0x35a   : > { %v664_v32 = vsel %vm557_vm7, %v1156_v31, 0.0  ;;  %v672_v33 = vpack.c.bf16 %v1156_v31, %v1156_v31  ;;  %v1158_v35 = vpop.eup %1157 }
 0x35b   : > { %665 = vadd.xlane.f32.xlu0 %v664_v32  ;;  %v658_v38 = vsel %vm557_vm7, %v1158_v35, 0.0  ;;  %v670_v42 = vpack.c.bf16 %v1158_v35, %v1158_v35  ;;  %v1145_v32 = vld [vmem:[%s1706_s7] ss:$0 sm:$0xff] }
 0x35c   : > { %1013 = vmatmul.msk.bf16.vlgmr.msrb.gmra.mxu3 %vm557_vm7, %v672_v33 }
 0x35e   : > { %v556_v34 = vld [vmem:[#allocation5 + $0xc] sm:$0xf] }
 0x35f   : > { %v736_v36 = vsel %vm677_vm8, %v556_v34, 0  ;;  %v1146_v34 = vld [vmem:[%s1707_s8] ss:$0 sm:$0xff] }
 0x360   : > { %745 = vmatpush.bf16.msra.mxu0 %v736_v36 }
 0x363   : > { %1014 = vmatmul.msk.bf16.vlgmr.msra.gmra.mxu0 %vm557_vm7, %v673_v37  ;;  %659 = vadd.xlane.f32.xlu0 %v658_v38 }
 0x366   : > { %v491_v39 = vpop.permute.xlu1 %490 }
 0x367   : > { %493 = vst.msk [vmem:[#allocation5] sm:$0xf] %vm483_vm6, %v491_v39 }
 0x36e   : > { %v553_v40 = vld [vmem:[#allocation5] sm:$0xf] }
 0x36f   : > { %v679_v41 = vsel %vm677_vm8, %v553_v40, 0 }
 0x370   : > { %688 = vmatpush.bf16.msrb.mxu1 %v679_v41 }
 0x373   : > { %1011 = vmatmul.msk.bf16.vlgmr.msrb.gmra.mxu1 %vm557_vm7, %v670_v42 }
 0x374   : > { %814 = vmatpush.bf16.msra.mxu1 %v1031_v3 }
 0x378   : > { %815 = vmatpush.bf16.msra.mxu1 %v1030_v4 }
 0x3c6   : > { %v663_v43 = vpop.xlane.xlu2 %662 }
 0x3c7   : > { %1159 = vrcp.f32 %v663_v43 }
 0x3c8   : > { %v669_v46 = vpop.xlane.xlu1 %668 }
 0x3cd   : > { %v1160_v45 = vpop.eup %1159 }
 0x3ce   : > { %v666_v44 = vpop.xlane.xlu0 %665 }
 0x3cf   : > { %1161 = vrcp.f32 %v666_v44 }
 0x3d0   : > { %1163 = vrcp.f32 %v669_v46 }
 0x3d5   : > { %v1162_v50 = vpop.eup %1161 }
 0x3d6   : > { %v1164_v53 = vpop.eup %1163  ;;  %v660_v59 = vpop.xlane.xlu0 %659 }
 0x3d7   : > { %v709_v47 = vpop.f32.mrf.mxu2  ;;  %1165 = vrcp.f32 %v660_v59 }
 0x3d8   : > { %v756_v48 = vmul.f32 %v1160_v45, %v709_v47 }
 0x3da   : > { %v760_v49 = vpack.c.bf16 %v756_v48, %v756_v48 }
 0x3dc   : > { %766 = vrot.lane.b32.xlu0 %v760_v49, %s1399_s11  ;;  %s1305_s11 = scalar_lea.hbm %s1304_s21, 8 }
 0x3dd   : > { %v1166_v62 = vpop.eup %1165  ;;  %p1306_p1 = scmp.ne.s32.totalorder %s1304_s21, %s1305_s11  ;;  %p1311_p0 = scmp.lt.s32.totalorder %s1309_s14, %s1305_s11 }
 0x3df   : > { %v711_v51 = vpop.f32.mrf.mxu2  ;;  %v728_v52 = vpop.f32.mrf.mxu3  ;;  %p1307_p3 = pnand %p1306_p1, %p1526_p13  ;;  %p1312_p2 = por %p1311_p0, %p1310_p9 }
 0x3e0   : > { %v757_v54 = vmul.f32 %v1162_v50, %v728_v52  ;;  %v747_v55 = vpop.f32.mrf.mxu0 }
 0x3e1   : > { %v758_v56 = vmul.f32 %v1164_v53, %v747_v55  ;;  %p1308_p5 = pneg %p1307_p3 }
 0x3e2   : > { %v761_v57 = vpack.c.bf16 %v757_v54, %v757_v54 }
 0x3e3   : > { %v762_v58 = vpack.c.bf16 %v758_v56, %v758_v56  ;;  %p1313_p6 = pnand %p1312_p2, %p1308_p5 }
 0x3e4   : > { %772 = vrot.lane.b32.xlu0 %v761_v57, %s1400_s16 }
 0x3e5   : > { %778 = vrot.lane.b32.xlu2 %v762_v58, %s1401_s30 }
 0x3e7   : > { %v730_v60 = vpop.f32.mrf.mxu3 }
 0x3e8   : > { %v749_v61 = vpop.f32.mrf.mxu0 }
 0x3f0   : > { %v690_v63 = vpop.f32.mrf.mxu1 }
 0x3f1   : > { %v755_v0 = vmul.f32 %v1166_v62, %v690_v63 }
 0x3f3   : > { %v759_v1 = vpack.c.bf16 %v755_v0, %v755_v0 }
 0x3f5   : > { %764 = vst.msk [vmem:[#allocation6] sm:$0xf] %vm483_vm6, %v759_v1 }
 0x3f8   : > { %v692_v2 = vpop.f32.mrf.mxu1 }
 0x43f   : > { %v779_v7 = vpop.permute.xlu2 %778 }
 0x44e   : > { %v767_v5 = vpop.permute.xlu0 %766 }
 0x44f   : > { %770 = vst.msk [vmem:[#allocation6] sm:$0xf] %vm769_vm9, %v767_v5 }
 0x456   : > { %v773_v6 = vpop.permute.xlu0 %772 }
 0x457   : > { %776 = vst.msk [vmem:[#allocation6] sm:$0xf] %vm775_vm10, %v773_v6 }
 0x458   : > { %782 = vst.msk [vmem:[#allocation6] sm:$0xf] %vm781_vm11, %v779_v7 }
 0x45f   : > { %v783_v9 = vld [vmem:[#allocation6] sm:$0xf] }
 0x460   : > { %1023 = vmatmul.msk.bf16.vlgmr.msra.gmra.mxu1 %vm403_vm0, %v783_v9 }
 0x4dd   : > { %v817_v12 = vpop.f32.mrf.mxu1 }
 0x4de   : > { %v818_v13 = vadd.f32 %v1144_v10, %v817_v12 }
 0x4e0   : > { %v825_v15 = vadd.f32 %v824_v14, %v818_v13 }
 0x4e2   : > { %v828_v16 = vsel %vm403_vm0, %v825_v15, 0.0 }
 0x4e3   : > { %829 = vadd.xlane.f32.xlu0 %v828_v16 }
 0x4e5   : > { %v819_v17 = vpop.f32.mrf.mxu1 }
 0x556   : > { %v830_v18 = vpop.xlane.xlu0 %829 }
 0x557   : > { %v838_v19 = vmul.f32 %v830_v18, %v1587_v8 }
 0x559   : > { %v839_v20 = vsub.f32 %v825_v15, %v838_v19 }
 0x55b   : > { %v840_v21 = vmul.f32 %v839_v20, %v839_v20 }
 0x55d   : > { %v841_v22 = vsel %vm403_vm0, %v840_v21, 0.0 }
 0x55e   : > { %842 = vadd.xlane.f32.xlu1 %v841_v22 }
 0x5d1   : > { %v843_v23 = vpop.xlane.xlu1 %842 }
 0x5d2   : > { %v844_v24 = vmul.f32 %v843_v23, %v1587_v8 }
 0x5d4   : > { %v845_v25 = vadd.f32 1e-05, %v844_v24 }
 0x5d6   : > { %1167 = vrsqrt.f32 %v845_v25  ;;  %vm852_vm13 = vweird.f32 %v845_v25 }
 0x5dc   : > { %v1168_v26 = vpop.eup %1167 }
 0x5dd   : > { %v847_v27 = vmul.f32 %v1168_v26, %v845_v25  ;;  %vm853_vm12 = vweird.f32 %v1168_v26 }
 0x5de   : > { %vm854_vm14 = vmor %vm852_vm13, %vm853_vm12 }
 0x5df   : > { %v848_v28 = vmul.f32 %v1168_v26, %v847_v27 }
 0x5e1   : > { %v849_v29 = vmul.f32 0.5, %v848_v28 }
 0x5e3   : > { %v850_v30 = vsub.f32 1.5, %v849_v29 }
 0x5e5   : > { %v851_v31 = vmul.f32 %v1168_v26, %v850_v30 }
 0x5e7   : > { %v855_v8 = vsel %vm854_vm14, %v1168_v26, %v851_v31 }
 0x5e8   : > { %v856_v33 = vmul.f32 %v855_v8, %v839_v20 }
 0x5ea   : > { %v860_v35 = vmul.f32 %v1145_v32, %v856_v33 }
 0x5ec   : > { %v864_v36 = vadd.f32 %v1146_v34, %v860_v35 }
 0x5ee   : > { %865 = vst.msk [vmem:[%s394_s25] sm:$0xff] %vm403_vm0, %v864_v36 }
 0x5ef   : > { %1316 = shalt.err (!%p1313_p6)
}
 0x5f0   : > { %1046 = dma.vmem_to_hbm [thread:$0]  (%p1526_p13), %s881_s13, 128, %s883_s26, %s867_s12  }
 0x5f1 PF: > { %s1734_s20 = sld [smem:[#allocation23_spill]] }
 0x5f2   : > { %s1735_s27 = sld [smem:[#allocation20_spill]] }
 0x5f3   : > { %s1736_s15 = sld [smem:[#allocation25_spill]] }
 0x5f7   : > { %p1071_p7 = scmp.ge.s32.totalorder %s1734_s20, 2 }
 0x5f8   : > { %s894_s17 = sand.u32 1, %s1735_s27  }
 0x5f9   : > { %p1737_p8 = scmp.ne.s32.totalorder %s1736_s15, 0  ;;  %s895_s18 = scalar_lea.sflag [#allocation9], %s894_s17 }
 0x5fb   : > { %p1062_p10 = pnand %p1071_p7, %p1737_p8 }
 0x5fd   : > { %p1063_p4 = pneg %p1062_p10 }
 0x5ff   : > { %1354 = dma.done.wait (%p1063_p4), %s895_s18, 128  }
 0x600   : > { %1356 = vsyncadd (%p1063_p4), %s895_s18, 4294967168  ;;  %s25_s14 = sadd.s32 1, %s1734_s20   ;;  %s1738_s24 = sld [smem:[#allocation21_spill]] }
 0x601   : > { %p22_p11 = scmp.ge.s32.totalorder %s25_s14, 4   ;;  %s1739_s11 = sld [smem:[#allocation26_spill]] }
 0x602   : > { %s1740_s12 = sld [smem:[#allocation22_spill]]  ;;  %s1742_s30 = smov %s1363_s10 }
 0x603   : > { %s1741_s13 = sld [smem:[#allocation24_spill]]  ;;  %24 = sbr.rel (!%p22_p11) target bundleno = 9 (0x9), region = 121 }
 0x606   : > { %s1743_s10 = smov %s1738_s24 }
 0x608   :  { %901 = vsyncpa [#allocation8], 1 }
 0x609   :  { %903 = vsyncpa [#allocation8 + $0x1], 1 }
 0x60a   :  { %904 = vsyncpa [#allocation11], 1 }
 0x60b   :  { %905 = vsyncpa [#allocation14], 1 }
 0x60c   :  { %906 = vsyncpa [#allocation9], 1 }
 0x60d   :  { %908 = vsyncpa [#allocation9 + $0x1], 1 }

</bundles_post_ra>
